<compile_context>
chip_gen: v7x
topology: tpu7x:2x2x1
jax: 0.10.0
libtpu: 0.0.40
codegen_flags: <defaults>
</compile_context>

<pallas_src>
import math

import jax
import jax.numpy as jnp
from jax.experimental import pallas as pl
from jax.experimental.pallas import tpu as pltpu

LANE = 128
SUBLANE_BF16 = 16        # bf16 packs 16 rows per vreg; keep batch tiles 16-aligned
MAX_TB = 512             # upper bound on rows per batch tile (amortizes grid-step cost)
NEG_INF = -1e30


def _round_up(x, m):
    return ((x + m - 1) // m) * m


# ------------------------------------------------------------------ kernel ----

def cnn1d_kernel(x_ref,
                 w1_ref, b1_ref, w2_ref, b2_ref,
                 w3_ref, b3_ref, w4_ref, b4_ref,
                 wfc_ref, bfc_ref,
                 out_ref):
    h_bf = x_ref[...]                                               # (TB, Cin*L) bf16
    for w_ref, b_ref in ((w1_ref, b1_ref), (w2_ref, b2_ref),
                         (w3_ref, b3_ref), (w4_ref, b4_ref)):
        acc = jnp.dot(h_bf, w_ref[...],                             # bf16 MXU, f32 acc
                      preferred_element_type=jnp.float32)
        h = jnp.maximum(acc + b_ref[...], 0.0)                      # f32 bias + ReLU (conv+BN)
        h_bf = h.astype(jnp.bfloat16)
    logits = jnp.dot(h_bf, wfc_ref[...],
                     preferred_element_type=jnp.float32) + bfc_ref[...]
    m = jnp.max(logits, axis=1, keepdims=True)                      # softmax(dim=1)
    e = jnp.exp(logits - m)                                         # padded lanes -> exp(-1e30)=0
    denom = jnp.sum(e, axis=1, keepdims=True)
    out_ref[...] = e / denom                                        # exact normalize; lane-dense store


# ----------------------------------------------------- parameter construction ----

def make_circulant_layer(w, b, gamma, beta, mean, var, eps, L):
    """Fold a circular Conv1d (weight (Cout,Cin,K), bias (Cout,)) followed by an
    eval-mode BatchNorm1d into a dense matmul:  y_flat = x_flat @ W_big + b_big.
    W returned in bf16 (MXU input), bias in f32 (VPU math stays f32)."""
    Cout, Cin, K = w.shape
    assert K <= L
    P = K // 2
    s = jnp.arange(L)[:, None]
    t = jnp.arange(L)[None, :]
    kk = (s - t + P) % L                                   # (L, L)
    mask = kk < K
    w_pad = jnp.pad(w, ((0, 0), (0, 0), (0, L - K)))       # K <= L
    blocks = jnp.where(mask[None, None], w_pad[:, :, kk], 0.0)   # (Cout, Cin, L, L)
    W_big = jnp.transpose(blocks, (1, 2, 0, 3)).reshape(Cin * L, Cout * L)
    scale = gamma / jnp.sqrt(var + eps)                    # (Cout,)
    shift = beta - scale * mean
    W_fold = W_big * jnp.repeat(scale, L)[None, :]
    b_fold = jnp.repeat(scale * b + shift, L)[None, :]     # (1, Cout*L)
    return W_fold.astype(jnp.bfloat16), b_fold.astype(jnp.float32)


def init_params(key, feature_n, class_c, in_ch=1, K=51):
    chans = [(in_ch, 4), (4, 2), (2, 4), (4, 1)]
    params = {}
    for i, (cin, cout) in enumerate(chans, start=1):
        key, kw, kb = jax.random.split(key, 3)
        bound = 1.0 / jnp.sqrt(cin * K)
        params[f"conv{i}_w"] = jax.random.uniform(kw, (cout, cin, K), jnp.float32, -bound, bound)
        params[f"conv{i}_b"] = jax.random.uniform(kb, (cout,), jnp.float32, -bound, bound)
        # BatchNorm1d defaults (freshly constructed module, eval mode)
        params[f"bn{i}_gamma"] = jnp.ones((cout,), jnp.float32)
        params[f"bn{i}_beta"] = jnp.zeros((cout,), jnp.float32)
        params[f"bn{i}_mean"] = jnp.zeros((cout,), jnp.float32)
        params[f"bn{i}_var"] = jnp.ones((cout,), jnp.float32)
    key, kw, kb = jax.random.split(key, 3)
    bound = 1.0 / jnp.sqrt(feature_n)
    params["fc_w"] = jax.random.uniform(kw, (class_c, feature_n), jnp.float32, -bound, bound)
    params["fc_b"] = jax.random.uniform(kb, (class_c,), jnp.float32, -bound, bound)
    return params


# ---------------------------------------------------------------- wrapper ----

def _resident_spec(shape):
    """Constant block index -> stays VMEM-resident across batch tiles; single-buffered
    so resident weights don't occupy 2x their size in VMEM."""
    try:
        return pl.BlockSpec(shape, lambda i: (0, 0), pipeline_mode=pl.Buffered(1))
    except TypeError:   # older jax without pipeline_mode kwarg
        return pl.BlockSpec(shape, lambda i: (0, 0))


def cnn1d_forward(x, params, feature_n, class_c, eps=1e-5):
    """x: (B, in_ch, L) float32  ->  softmax probs (B, class_c)."""
    B, in_ch, L = x.shape
    assert L == feature_n and L % LANE == 0, "FEATURE_N must be a multiple of 128"
    # bf16 streaming input: halves the only per-tile HBM->VMEM traffic.
    x_flat = x.reshape(B, in_ch * L).astype(jnp.bfloat16)

    folded = []
    max_cols = 0
    for i in range(1, 5):
        W, b = make_circulant_layer(
            params[f"conv{i}_w"], params[f"conv{i}_b"],
            params[f"bn{i}_gamma"], params[f"bn{i}_beta"],
            params[f"bn{i}_mean"], params[f"bn{i}_var"], eps, L)
        folded += [W, b]
        max_cols = max(max_cols, W.shape[1])

    # Lane-dense FC tail: pad class logits to a full 128-lane slab.
    C_pad = _round_up(class_c, LANE)
    wfc = jnp.zeros((L, C_pad), jnp.float32).at[:, :class_c].set(
        params["fc_w"].T).astype(jnp.bfloat16)
    bfc = jnp.full((1, C_pad), NEG_INF, jnp.float32).at[0, :class_c].set(
        params["fc_b"].astype(jnp.float32))

    # Batch tiling: target >=2 grid steps (keeps both v7x TensorCores busy via
    # "parallel"), tiles up to MAX_TB rows to amortize per-step overhead / MXU
    # fill-drain, 16-aligned for bf16 sublane packing.
    TB = _round_up(max(1, math.ceil(B / 2)), SUBLANE_BF16)
    TB = max(SUBLANE_BF16, min(MAX_TB, TB))
    B_pad = _round_up(B, TB)
    if B_pad != B:
        x_flat = jnp.pad(x_flat, ((0, B_pad - B), (0, 0)))

    weight_args = (*folded, wfc, bfc)

    in_specs = [pl.BlockSpec((TB, in_ch * L), lambda i: (i, 0))]
    in_specs += [_resident_spec(a.shape) for a in weight_args]
    out_specs = pl.BlockSpec((TB, C_pad), lambda i: (i, 0))

    # VMEM budget: weights single-buffered + double-buffered batch tiles + intermediates,
    # clamped below physical VMEM (v7x has only 64 MiB) with headroom for compiler scratch.
    weight_bytes = sum(int(a.size) * a.dtype.itemsize for a in weight_args)
    io_bytes = 2 * TB * (in_ch * L * 2 + C_pad * 4)         # bf16 in / f32 out, double-buffered
    act_bytes = 4 * TB * max_cols * 4                       # in-kernel intermediates (rough)
    need = weight_bytes + io_bytes + act_bytes
    try:
        phys = int(pltpu.get_tpu_info().vmem_capacity_bytes)
    except Exception:
        phys = 64 << 20                                     # v7x per-TC VMEM (smallest gen)
    cap = max(24 << 20, phys - (16 << 20))
    vmem_limit = int(min(cap, max(32 << 20, 2 * need)))

    out = pl.pallas_call(
        cnn1d_kernel,
        out_shape=jax.ShapeDtypeStruct((B_pad, C_pad), jnp.float32),
        grid=(B_pad // TB,),
        in_specs=in_specs,
        out_specs=out_specs,
        compiler_params=pltpu.CompilerParams(
            dimension_semantics=("parallel",),   # batch tiles shard across v7x's 2 TCs
            vmem_limit_bytes=vmem_limit),
    )(x_flat, *weight_args)
    return out[:B, :class_c]


# ----------------------------------------------------------- pure-JAX check ----

def reference_forward(x, params, eps=1e-5):
    def circ_conv(h, w, b):
        Cout, Cin, K = w.shape
        P = K // 2
        out = jnp.zeros((h.shape[0], Cout, h.shape[2]), jnp.float32)
        for k in range(K):
            out = out + jnp.einsum("oc,bcl->bol", w[:, :, k], jnp.roll(h, P - k, axis=-1))
        return out + b[None, :, None]

    def bn(h, g, bta, m, v):
        s = g / jnp.sqrt(v + eps)
        return s[None, :, None] * (h - m[None, :, None]) + bta[None, :, None]

    h = x.astype(jnp.float32)
    for i in range(1, 5):
        h = circ_conv(h, params[f"conv{i}_w"], params[f"conv{i}_b"])
        h = bn(h, params[f"bn{i}_gamma"], params[f"bn{i}_beta"],
               params[f"bn{i}_mean"], params[f"bn{i}_var"])
        h = jnp.maximum(h, 0.0)
    h = h.reshape(h.shape[0], -1)
    logits = h @ params["fc_w"].T + params["fc_b"]
    return jax.nn.softmax(logits, axis=1)


# ------------------------------------------------------------------- main ----

if __name__ == "__main__":
    FEATURE_N = 128     # sequence length (lane-aligned)
    CLASS_C = 8
    IN_CH = 1
    B = 4

    key = jax.random.PRNGKey(0)
    key, kx = jax.random.split(key)
    x = jax.random.normal(kx, (B, IN_CH, FEATURE_N), jnp.float32)
    params = init_params(key, FEATURE_N, CLASS_C, IN_CH)

    out = jax.block_until_ready(cnn1d_forward(x, params, FEATURE_N, CLASS_C))
    ref = jax.block_until_ready(reference_forward(x, params))

    assert out.shape == (B, CLASS_C)
    # Exact-divide softmax: rows sum to 1 up to f32 rounding.
    assert bool(jnp.allclose(jnp.sum(out, axis=1), 1.0, atol=1e-5))
    # bf16 weights/activations -> relaxed tolerance vs the f32 reference.
    assert bool(jnp.allclose(out, ref, atol=2e-2))

    print("KERNEL_OK")
</pallas_src>

<mosaic_0001>
module attributes {stable_mosaic.version = 11 : i64} {
  func.func @cnn1d_kernel(%arg0: i32, %arg1: memref<16x128xbf16, #tpu.memory_space<vmem>>, %arg2: memref<128x512xbf16, #tpu.memory_space<vmem>>, %arg3: memref<1x512xf32, #tpu.memory_space<vmem>>, %arg4: memref<512x256xbf16, #tpu.memory_space<vmem>>, %arg5: memref<1x256xf32, #tpu.memory_space<vmem>>, %arg6: memref<256x512xbf16, #tpu.memory_space<vmem>>, %arg7: memref<1x512xf32, #tpu.memory_space<vmem>>, %arg8: memref<512x128xbf16, #tpu.memory_space<vmem>>, %arg9: memref<1x128xf32, #tpu.memory_space<vmem>>, %arg10: memref<128x128xbf16, #tpu.memory_space<vmem>>, %arg11: memref<1x128xf32, #tpu.memory_space<vmem>>, %arg12: memref<16x128xf32, #tpu.memory_space<vmem>>) attributes {dimension_semantics = [#tpu.dimension_semantics<parallel>], iteration_bounds = array<i64: 1>, scalar_prefetch = 0 : i64, scratch_operands = 0 : i64, tpu.core_type = #tpu.core_type<tc>, window_params = [{transform_indices = @transform_0, window_bounds = array<i64: 16, 128>}, {pipeline_mode = #tpu.pipeline_mode<synchronous>, transform_indices = @transform_1, window_bounds = array<i64: 128, 512>}, {pipeline_mode = #tpu.pipeline_mode<synchronous>, transform_indices = @transform_2, window_bounds = array<i64: 1, 512>}, {pipeline_mode = #tpu.pipeline_mode<synchronous>, transform_indices = @transform_3, window_bounds = array<i64: 512, 256>}, {pipeline_mode = #tpu.pipeline_mode<synchronous>, transform_indices = @transform_4, window_bounds = array<i64: 1, 256>}, {pipeline_mode = #tpu.pipeline_mode<synchronous>, transform_indices = @transform_5, window_bounds = array<i64: 256, 512>}, {pipeline_mode = #tpu.pipeline_mode<synchronous>, transform_indices = @transform_6, window_bounds = array<i64: 1, 512>}, {pipeline_mode = #tpu.pipeline_mode<synchronous>, transform_indices = @transform_7, window_bounds = array<i64: 512, 128>}, {pipeline_mode = #tpu.pipeline_mode<synchronous>, transform_indices = @transform_8, window_bounds = array<i64: 1, 128>}, {pipeline_mode = #tpu.pipeline_mode<synchronous>, transform_indices = @transform_9, window_bounds = array<i64: 128, 128>}, {pipeline_mode = #tpu.pipeline_mode<synchronous>, transform_indices = @transform_10, window_bounds = array<i64: 1, 128>}, {transform_indices = @transform_11, window_bounds = array<i64: 16, 128>}]} {
    %c0 = arith.constant 0 : index
    %c0_0 = arith.constant 0 : index
    %0 = vector.load %arg1[%c0, %c0_0] : memref<16x128xbf16, #tpu.memory_space<vmem>>, vector<16x128xbf16>
    %c0_1 = arith.constant 0 : index
    %c0_2 = arith.constant 0 : index
    %1 = vector.load %arg2[%c0_1, %c0_2] : memref<128x512xbf16, #tpu.memory_space<vmem>>, vector<128x512xbf16>
    %cst = arith.constant dense<0.000000e+00> : vector<16x512xf32>
    %2 = tpu.matmul %0, %1, %cst {dimension_numbers = #tpu.dot_dimension_numbers<[1], [0], [0], [1], [0, 0, 1, 1], [], []>} : vector<16x128xbf16>, vector<128x512xbf16>, vector<16x512xf32> -> vector<16x512xf32>
    %c0_3 = arith.constant 0 : index
    %c0_4 = arith.constant 0 : index
    %3 = vector.load %arg3[%c0_3, %c0_4] : memref<1x512xf32, #tpu.memory_space<vmem>>, vector<1x512xf32>
    %4 = vector.broadcast %3 : vector<1x512xf32> to vector<16x512xf32>
    %5 = arith.addf %2, %4 : vector<16x512xf32>
    %cst_5 = arith.constant 0.000000e+00 : f32
    %6 = vector.broadcast %cst_5 : f32 to vector<16x512xf32>
    %7 = arith.maximumf %5, %6 : vector<16x512xf32>
    %8 = arith.truncf %7 : vector<16x512xf32> to vector<16x512xbf16>
    %c0_6 = arith.constant 0 : index
    %c0_7 = arith.constant 0 : index
    %9 = vector.load %arg4[%c0_6, %c0_7] : memref<512x256xbf16, #tpu.memory_space<vmem>>, vector<512x256xbf16>
    %cst_8 = arith.constant dense<0.000000e+00> : vector<16x256xf32>
    %10 = tpu.matmul %8, %9, %cst_8 {dimension_numbers = #tpu.dot_dimension_numbers<[1], [0], [0], [1], [0, 0, 1, 1], [], []>} : vector<16x512xbf16>, vector<512x256xbf16>, vector<16x256xf32> -> vector<16x256xf32>
    %c0_9 = arith.constant 0 : index
    %c0_10 = arith.constant 0 : index
    %11 = vector.load %arg5[%c0_9, %c0_10] : memref<1x256xf32, #tpu.memory_space<vmem>>, vector<1x256xf32>
    %12 = vector.broadcast %11 : vector<1x256xf32> to vector<16x256xf32>
    %13 = arith.addf %10, %12 : vector<16x256xf32>
    %cst_11 = arith.constant 0.000000e+00 : f32
    %14 = vector.broadcast %cst_11 : f32 to vector<16x256xf32>
    %15 = arith.maximumf %13, %14 : vector<16x256xf32>
    %16 = arith.truncf %15 : vector<16x256xf32> to vector<16x256xbf16>
    %c0_12 = arith.constant 0 : index
    %c0_13 = arith.constant 0 : index
    %17 = vector.load %arg6[%c0_12, %c0_13] : memref<256x512xbf16, #tpu.memory_space<vmem>>, vector<256x512xbf16>
    %cst_14 = arith.constant dense<0.000000e+00> : vector<16x512xf32>
    %18 = tpu.matmul %16, %17, %cst_14 {dimension_numbers = #tpu.dot_dimension_numbers<[1], [0], [0], [1], [0, 0, 1, 1], [], []>} : vector<16x256xbf16>, vector<256x512xbf16>, vector<16x512xf32> -> vector<16x512xf32>
    %c0_15 = arith.constant 0 : index
    %c0_16 = arith.constant 0 : index
    %19 = vector.load %arg7[%c0_15, %c0_16] : memref<1x512xf32, #tpu.memory_space<vmem>>, vector<1x512xf32>
    %20 = vector.broadcast %19 : vector<1x512xf32> to vector<16x512xf32>
    %21 = arith.addf %18, %20 : vector<16x512xf32>
    %cst_17 = arith.constant 0.000000e+00 : f32
    %22 = vector.broadcast %cst_17 : f32 to vector<16x512xf32>
    %23 = arith.maximumf %21, %22 : vector<16x512xf32>
    %24 = arith.truncf %23 : vector<16x512xf32> to vector<16x512xbf16>
    %c0_18 = arith.constant 0 : index
    %c0_19 = arith.constant 0 : index
    %25 = vector.load %arg8[%c0_18, %c0_19] : memref<512x128xbf16, #tpu.memory_space<vmem>>, vector<512x128xbf16>
    %cst_20 = arith.constant dense<0.000000e+00> : vector<16x128xf32>
    %26 = tpu.matmul %24, %25, %cst_20 {dimension_numbers = #tpu.dot_dimension_numbers<[1], [0], [0], [1], [0, 0, 1, 1], [], []>} : vector<16x512xbf16>, vector<512x128xbf16>, vector<16x128xf32> -> vector<16x128xf32>
    %c0_21 = arith.constant 0 : index
    %c0_22 = arith.constant 0 : index
    %27 = vector.load %arg9[%c0_21, %c0_22] : memref<1x128xf32, #tpu.memory_space<vmem>>, vector<1x128xf32>
    %28 = vector.broadcast %27 : vector<1x128xf32> to vector<16x128xf32>
    %29 = arith.addf %26, %28 : vector<16x128xf32>
    %cst_23 = arith.constant 0.000000e+00 : f32
    %30 = vector.broadcast %cst_23 : f32 to vector<16x128xf32>
    %31 = arith.maximumf %29, %30 : vector<16x128xf32>
    %32 = arith.truncf %31 : vector<16x128xf32> to vector<16x128xbf16>
    %c0_24 = arith.constant 0 : index
    %c0_25 = arith.constant 0 : index
    %33 = vector.load %arg10[%c0_24, %c0_25] : memref<128x128xbf16, #tpu.memory_space<vmem>>, vector<128x128xbf16>
    %cst_26 = arith.constant dense<0.000000e+00> : vector<16x128xf32>
    %34 = tpu.matmul %32, %33, %cst_26 {dimension_numbers = #tpu.dot_dimension_numbers<[1], [0], [0], [1], [0, 0, 1, 1], [], []>} : vector<16x128xbf16>, vector<128x128xbf16>, vector<16x128xf32> -> vector<16x128xf32>
    %c0_27 = arith.constant 0 : index
    %c0_28 = arith.constant 0 : index
    %35 = vector.load %arg11[%c0_27, %c0_28] : memref<1x128xf32, #tpu.memory_space<vmem>>, vector<1x128xf32>
    %36 = vector.broadcast %35 : vector<1x128xf32> to vector<16x128xf32>
    %37 = arith.addf %34, %36 : vector<16x128xf32>
    %cst_29 = arith.constant dense<0xFF800000> : vector<16xf32>
    %38 = vector.multi_reduction <maximumf>, %37, %cst_29 [1] : vector<16x128xf32> to vector<16xf32>
    %39 = vector.shape_cast %38 : vector<16xf32> to vector<16x1xf32>
    %40 = vector.broadcast %39 : vector<16x1xf32> to vector<16x128xf32>
    %41 = arith.subf %37, %40 : vector<16x128xf32>
    %42 = math.exp %41 : vector<16x128xf32>
    %cst_30 = arith.constant dense<0.000000e+00> : vector<16xf32>
    %43 = vector.multi_reduction <add>, %42, %cst_30 [1] : vector<16x128xf32> to vector<16xf32>
    %44 = vector.shape_cast %43 : vector<16xf32> to vector<16x1xf32>
    %45 = vector.broadcast %44 : vector<16x1xf32> to vector<16x128xf32>
    %46 = arith.divf %42, %45 : vector<16x128xf32>
    %c0_31 = arith.constant 0 : index
    %c0_32 = arith.constant 0 : index
    %47 = vector.load %arg12[%c0_31, %c0_32] : memref<16x128xf32, #tpu.memory_space<vmem>>, vector<16x128xf32>
    tpu.vector_store %arg12[%c0_31, %c0_32], %46 {strides = array<i32>} : memref<16x128xf32, #tpu.memory_space<vmem>>, vector<16x128xf32>,
    return
  }
  func.func @transform_0(%arg0: i32) -> (i32, i32) {
    %c0_i32 = arith.constant 0 : i32
    %c0_i32_0 = arith.constant 0 : i32
    return %arg0, %c0_i32 : i32, i32
  }
  func.func @transform_1(%arg0: i32) -> (i32, i32) {
    %c0_i32 = arith.constant 0 : i32
    %c0_i32_0 = arith.constant 0 : i32
    %c0_i32_1 = arith.constant 0 : i32
    return %c0_i32, %c0_i32_0 : i32, i32
  }
  func.func @transform_2(%arg0: i32) -> (i32, i32) {
    %c0_i32 = arith.constant 0 : i32
    %c0_i32_0 = arith.constant 0 : i32
    %c0_i32_1 = arith.constant 0 : i32
    return %c0_i32, %c0_i32_0 : i32, i32
  }
  func.func @transform_3(%arg0: i32) -> (i32, i32) {
    %c0_i32 = arith.constant 0 : i32
    %c0_i32_0 = arith.constant 0 : i32
    %c0_i32_1 = arith.constant 0 : i32
    return %c0_i32, %c0_i32_0 : i32, i32
  }
  func.func @transform_4(%arg0: i32) -> (i32, i32) {
    %c0_i32 = arith.constant 0 : i32
    %c0_i32_0 = arith.constant 0 : i32
    %c0_i32_1 = arith.constant 0 : i32
    return %c0_i32, %c0_i32_0 : i32, i32
  }
  func.func @transform_5(%arg0: i32) -> (i32, i32) {
    %c0_i32 = arith.constant 0 : i32
    %c0_i32_0 = arith.constant 0 : i32
    %c0_i32_1 = arith.constant 0 : i32
    return %c0_i32, %c0_i32_0 : i32, i32
  }
  func.func @transform_6(%arg0: i32) -> (i32, i32) {
    %c0_i32 = arith.constant 0 : i32
    %c0_i32_0 = arith.constant 0 : i32
    %c0_i32_1 = arith.constant 0 : i32
    return %c0_i32, %c0_i32_0 : i32, i32
  }
  func.func @transform_7(%arg0: i32) -> (i32, i32) {
    %c0_i32 = arith.constant 0 : i32
    %c0_i32_0 = arith.constant 0 : i32
    %c0_i32_1 = arith.constant 0 : i32
    return %c0_i32, %c0_i32_0 : i32, i32
  }
  func.func @transform_8(%arg0: i32) -> (i32, i32) {
    %c0_i32 = arith.constant 0 : i32
    %c0_i32_0 = arith.constant 0 : i32
    %c0_i32_1 = arith.constant 0 : i32
    return %c0_i32, %c0_i32_0 : i32, i32
  }
  func.func @transform_9(%arg0: i32) -> (i32, i32) {
    %c0_i32 = arith.constant 0 : i32
    %c0_i32_0 = arith.constant 0 : i32
    %c0_i32_1 = arith.constant 0 : i32
    return %c0_i32, %c0_i32_0 : i32, i32
  }
  func.func @transform_10(%arg0: i32) -> (i32, i32) {
    %c0_i32 = arith.constant 0 : i32
    %c0_i32_0 = arith.constant 0 : i32
    %c0_i32_1 = arith.constant 0 : i32
    return %c0_i32, %c0_i32_0 : i32, i32
  }
  func.func @transform_11(%arg0: i32) -> (i32, i32) {
    %c0_i32 = arith.constant 0 : i32
    %c0_i32_0 = arith.constant 0 : i32
    return %arg0, %c0_i32 : i32, i32
  }
}

</mosaic_0001>

<bundles_post_ra>
// kernel: tpu_custom_call.1
= control target key start
LH: loop header
LB: loop body
LE: loop exit
PB: predicated region body
PF: predicated region fallthrough
CT: control target
= control target key end

     0   :  { %16 = vsyncpa [#allocation3], 0  ;;  %s2912_s0 = inlined_call_operand.hbm [shape: bf16[16,128], index: 0, kind: input, shape index: {}]   ;;  %s2913_s1 = inlined_call_operand.hbm [shape: bf16[128,512], index: 1, kind: input, shape index: {}]   ;;  %s2914_s2 = inlined_call_operand.vmem [shape: f32[1,512], index: 2, kind: input, shape index: {}]   ;;  %s2915_s3 = inlined_call_operand.hbm [shape: bf16[512,256], index: 3, kind: input, shape index: {}]   ;;  %s2916_s4 = inlined_call_operand.vmem [shape: f32[1,256], index: 4, kind: input, shape index: {}]   ;;  %s2917_s5 = inlined_call_operand.hbm [shape: bf16[256,512], index: 5, kind: input, shape index: {}]   ;;  %s2918_s6 = inlined_call_operand.vmem [shape: f32[1,512], index: 6, kind: input, shape index: {}]   ;;  %s2919_s7 = inlined_call_operand.hbm [shape: bf16[512,128], index: 7, kind: input, shape index: {}]   ;;  %s2920_s8 = inlined_call_operand.vmem [shape: f32[1,128], index: 8, kind: input, shape index: {}]   ;;  %s2921_s9 = inlined_call_operand.hbm [shape: bf16[128,128], index: 9, kind: input, shape index: {}]   ;;  %s2922_s10 = inlined_call_operand.vmem [shape: f32[1,128], index: 10, kind: input, shape index: {}]   ;;  %s2923_s11 = inlined_call_operand.hbm [shape: f32[16,128], index: 11, kind: output, shape index: {}]  }
   0x1   :  { %17 = vsyncpa [#allocation6], 0 }
   0x2   :  { %18 = vsyncpa [#allocation9], 0 }
   0x3   :  { %19 = vsyncpa [#allocation12], 0 }
   0x4   :  { %20 = vsyncpa [#allocation4], 0  ;;  %s2687_s17 = smov [#allocation5]   ;;  %s2523_s21 = scalar_lea.hbm %s2913_s1, 4096 }
   0x5   :  { %s38_s18 = sshll.u32 %s2687_s17, 4  ;;  %p2524_p0 = scmp.ne.s32.totalorder %s2913_s1, %s2523_s21  ;;  %s39_s18 = int_to_ptr.vmem [resolvable:$true] %s38_s18 }
   0x6   :  { %p2527_p1 = scmp.lt.u32.totalorder %s2523_s21, %s2913_s1 }
   0x8   :  { %p2529_p2 = pnand %p2527_p1, %p2524_p0 }
   0xa   :  { %2532 = shalt.err (!%p2529_p2)
}
   0xb   :  { %s2533_s26 = scalar_lea.vmem %s39_s18, 4096  ;;  %p2538_p4 = scmp.lt.s32.totalorder %s39_s18, %s39_s18 }
   0xc   :  { %p2534_p3 = scmp.ne.s32.totalorder %s39_s18, %s2533_s26  ;;  %p2539_p5 = scmp.lt.s32.totalorder %s2533_s26, %s2533_s26 }
   0xe   :  { %p2540_p6 = por %p2539_p5, %p2538_p4 }
  0x10   :  { %p2541_p7 = pnand %p2540_p6, %p2534_p3 }
  0x12   :  { %2544 = shalt.err (!%p2541_p7)
}
  0x13   :  { %s2688_s27 = smov 256   ;;  %s2689_s28 = smov 16  }
  0x14   :  { %44 = dma.hbm_to_vmem [thread:$0]  %s2913_s1, 4096, %s39_s18, [#allocation6], %s2688_s27, %s2688_s27, %s2689_s28  }
  0x15   :  { %s2690_s12 = smov [#allocation8]   ;;  %s2691_s14 = smov [#allocation2]  }
  0x16   :  { %s66_s13 = sshll.u32 %s2690_s12, 4  ;;  %s26_s15 = sshll.u32 %s2691_s14, 4  ;;  %s67_s13 = int_to_ptr.vmem [resolvable:$true] %s66_s13  ;;  %s27_s15 = int_to_ptr.vmem [resolvable:$true] %s26_s15 }
  0x17   :  { %s2545_s19 = scalar_lea.hbm %s2917_s5, 8192 }
  0x18   :  { %p2546_p8 = scmp.ne.s32.totalorder %s2917_s5, %s2545_s19  ;;  %p2549_p9 = scmp.lt.u32.totalorder %s2545_s19, %s2917_s5 }
  0x1a   :  { %p2551_p10 = pnand %p2549_p9, %p2546_p8 }
  0x1c   :  { %2554 = shalt.err (!%p2551_p10)
}
  0x1d   :  { %s2555_s1 = scalar_lea.vmem %s67_s13, 8192  ;;  %p2560_p12 = scmp.lt.s32.totalorder %s67_s13, %s67_s13 }
  0x1e   :  { %p2556_p11 = scmp.ne.s32.totalorder %s67_s13, %s2555_s1  ;;  %p2561_p13 = scmp.lt.s32.totalorder %s2555_s1, %s2555_s1 }
  0x20   :  { %p2562_p0 = por %p2561_p13, %p2560_p12 }
  0x22   :  { %p2563_p1 = pnand %p2562_p0, %p2556_p11 }
  0x24   :  { %2566 = shalt.err (!%p2563_p1)
}
  0x25   :  { %72 = dma.hbm_to_vmem [thread:$0]  %s2917_s5, 8192, %s67_s13, [#allocation9], %s2688_s27, %s2688_s27, %s2689_s28  }
  0x26   :  { %s2567_s29 = scalar_lea.hbm %s2912_s0, 128 }
  0x27   :  { %p2568_p2 = scmp.ne.s32.totalorder %s2912_s0, %s2567_s29  ;;  %p2571_p3 = scmp.lt.u32.totalorder %s2567_s29, %s2912_s0 }
  0x29   :  { %p2573_p4 = pnand %p2571_p3, %p2568_p2 }
  0x2b   :  { %2576 = shalt.err (!%p2573_p4)
}
  0x2c   :  { %s2577_s17 = scalar_lea.vmem %s27_s15, 128  ;;  %p2582_p6 = scmp.lt.s32.totalorder %s27_s15, %s27_s15 }
  0x2d   :  { %p2578_p5 = scmp.ne.s32.totalorder %s27_s15, %s2577_s17  ;;  %p2583_p7 = scmp.lt.s32.totalorder %s2577_s17, %s2577_s17 }
  0x2f   :  { %p2584_p8 = por %p2583_p7, %p2582_p6 }
  0x31   :  { %p2585_p9 = pnand %p2584_p8, %p2578_p5 }
  0x33   :  { %2588 = shalt.err (!%p2585_p9)
}
  0x34   :  { %s2692_s5 = smov 64   ;;  %s2693_s27 = smov 4  }
  0x35   :  { %32 = dma.hbm_to_vmem [thread:$0]  %s2912_s0, 128, %s27_s15, [#allocation3], %s2692_s5, %s2692_s5, %s2693_s27  }
  0x36   :  { %s2694_s19 = smov [#allocation7]   ;;  %s2589_s23 = scalar_lea.hbm %s2915_s3, 8192 }
  0x37   :  { %s52_s20 = sshll.u32 %s2694_s19, 4  ;;  %p2590_p10 = scmp.ne.s32.totalorder %s2915_s3, %s2589_s23  ;;  %s53_s20 = int_to_ptr.vmem [resolvable:$true] %s52_s20 }
  0x38   :  { %p2593_p11 = scmp.lt.u32.totalorder %s2589_s23, %s2915_s3 }
  0x3a   :  { %p2595_p12 = pnand %p2593_p11, %p2590_p10 }
  0x3c   :  { %2598 = shalt.err (!%p2595_p12)
}
  0x3d   :  { %s2599_s26 = scalar_lea.vmem %s53_s20, 8192  ;;  %p2604_p0 = scmp.lt.s32.totalorder %s53_s20, %s53_s20 }
  0x3e   :  { %p2600_p13 = scmp.ne.s32.totalorder %s53_s20, %s2599_s26  ;;  %p2605_p1 = scmp.lt.s32.totalorder %s2599_s26, %s2599_s26 }
  0x40   :  { %p2606_p2 = por %p2605_p1, %p2604_p0 }
  0x42   :  { %p2607_p3 = pnand %p2606_p2, %p2600_p13 }
  0x44   :  { %2610 = shalt.err (!%p2607_p3)
}
  0x45   :  { %s2695_s0 = smov 128   ;;  %s2696_s15 = smov 8  }
  0x46   :  { %58 = dma.hbm_to_vmem [thread:$0]  %s2915_s3, 8192, %s53_s20, [#allocation6], %s2695_s0, %s2695_s0, %s2696_s15  }
  0x47   :  { %s2697_s12 = smov [#allocation10]   ;;  %s2698_s16 = smov [#allocation11]  }
  0x48   :  { %s80_s14 = sshll.u32 %s2697_s12, 4  ;;  %s94_s17 = sshll.u32 %s2698_s16, 4  ;;  %s81_s14 = int_to_ptr.vmem [resolvable:$true] %s80_s14  ;;  %s2817_s17 = int_to_ptr.vmem [resolvable:$true] %s94_s17 }
  0x49   :  { %s2611_s19 = scalar_lea.hbm %s2919_s7, 4096 }
  0x4a   :  { %p2612_p4 = scmp.ne.s32.totalorder %s2919_s7, %s2611_s19  ;;  %p2615_p5 = scmp.lt.u32.totalorder %s2611_s19, %s2919_s7 }
  0x4c   :  { %p2617_p6 = pnand %p2615_p5, %p2612_p4 }
  0x4e   :  { %2620 = shalt.err (!%p2617_p6)
}
  0x4f   :  { %s2621_s3 = scalar_lea.vmem %s81_s14, 4096  ;;  %p2626_p8 = scmp.lt.s32.totalorder %s81_s14, %s81_s14 }
  0x50   :  { %p2622_p7 = scmp.ne.s32.totalorder %s81_s14, %s2621_s3  ;;  %p2627_p9 = scmp.lt.s32.totalorder %s2621_s3, %s2621_s3 }
  0x52   :  { %p2628_p10 = por %p2627_p9, %p2626_p8 }
  0x54   :  { %p2629_p11 = pnand %p2628_p10, %p2622_p7 }
  0x56   :  { %2632 = shalt.err (!%p2629_p11)
}
  0x57   :  { %86 = dma.hbm_to_vmem [thread:$0]  %s2919_s7, 4096, %s81_s14, [#allocation9], %s2692_s5, %s2692_s5, %s2693_s27  }
  0x58   :  { %s2633_s26 = scalar_lea.hbm %s2921_s9, 1024 }
  0x59   :  { %p2634_p12 = scmp.ne.s32.totalorder %s2921_s9, %s2633_s26  ;;  %p2637_p13 = scmp.lt.u32.totalorder %s2633_s26, %s2921_s9 }
  0x5b   :  { %p2639_p0 = pnand %p2637_p13, %p2634_p12 }
  0x5d   :  { %2642 = shalt.err (!%p2639_p0)
}
  0x5e   :  { %s2643_s28 = scalar_lea.vmem %s2817_s17, 1024  ;;  %p2648_p2 = scmp.lt.s32.totalorder %s2817_s17, %s2817_s17 }
  0x5f   :  { %p2644_p1 = scmp.ne.s32.totalorder %s2817_s17, %s2643_s28  ;;  %p2649_p3 = scmp.lt.s32.totalorder %s2643_s28, %s2643_s28 }
  0x61   :  { %p2650_p4 = por %p2649_p3, %p2648_p2 }
  0x63   :  { %p2651_p5 = pnand %p2650_p4, %p2644_p1 }
  0x65   :  { %2654 = shalt.err (!%p2651_p5)
}
  0x66   :  { %100 = dma.hbm_to_vmem [thread:$0]  %s2921_s9, 1024, %s2817_s17, [#allocation12], %s2692_s5, %s2692_s5, %s2693_s27  }
  0x67   :  { %2677 = dma.done.wait [#allocation3], 128  }
  0x68   :  { %2678 = vsyncadd [#allocation3], 4294967168 }
  0x69   :  { %2679 = dma.done.wait [#allocation6], 12288  }
  0x6a   :  { %2680 = vsyncadd [#allocation6], 4294955008 }
  0x6b   :  { %2681 = dma.done.wait [#allocation9], 12288  }
  0x6c   :  { %2682 = vsyncadd [#allocation9], 4294955008 }
  0x6d   :  { %2683 = dma.done.wait [#allocation12], 1024  }
  0x6e   :  { %2684 = vsyncadd [#allocation12], 4294966272  ;;  %v2699_v0 = vmov 0   ;;  %v2234_v1 = vld [vmem:[#allocation5 + $0x4] ss:$16 sps:$4 sm:$0xff]   ;;  %v2258_v29 = vld [vmem:[#allocation2] sm:$0xff]  }
  0x6f   :  { %376 = vmatprep.mubr.bf16.mxu0 %v2699_v0  ;;  %419 = vmatprep.mubr.bf16.mxu1 %v2699_v0  ;;  %v2236_v2 = vld [vmem:[#allocation5] ss:$16 sps:$4 sm:$0xff]   ;;  %v2237_v3 = vld [vmem:[#allocation5 + $0x24] ss:$16 sps:$4 sm:$0xff]   ;;  %v2259_v10 = vld [vmem:[#allocation5 + $0xc] ss:$16 sps:$4 sm:$0xff]  }
  0x70   :  { %344 = vmatprep.subr.bf16.mxu0 %v2234_v1  ;;  %v2239_v4 = vld [vmem:[#allocation5 + $0x20] ss:$16 sps:$4 sm:$0xff]   ;;  %v2240_v5 = vld [vmem:[#allocation5 + $0x44] ss:$16 sps:$4 sm:$0xff]   ;;  %v2261_v11 = vld [vmem:[#allocation5 + $0x8] ss:$16 sps:$4 sm:$0xff]   ;;  %387 = vmatprep.subr.bf16.mxu1 %v2259_v10 }
  0x71   :  { %345 = vmatpush1.bf16.msra.mxu0 %v2236_v2  ;;  %v2242_v6 = vld [vmem:[#allocation5 + $0x40] ss:$16 sps:$4 sm:$0xff]   ;;  %v2243_v7 = vld [vmem:[#allocation5 + $0x64] ss:$16 sps:$4 sm:$0xff]   ;;  %v2262_v12 = vld [vmem:[#allocation5 + $0x2c] ss:$16 sps:$4 sm:$0xff]   ;;  %388 = vmatpush1.bf16.msra.mxu1 %v2261_v11 }
  0x72   :  { %346 = vmatprep.subr.bf16.mxu0 %v2237_v3  ;;  %v2245_v8 = vld [vmem:[#allocation5 + $0x60] ss:$16 sps:$4 sm:$0xff]   ;;  %v2246_v9 = vld [vmem:[#allocation5 + $0x84] ss:$16 sps:$4 sm:$0xff]   ;;  %v2264_v14 = vld [vmem:[#allocation5 + $0x28] ss:$16 sps:$4 sm:$0xff]   ;;  %389 = vmatprep.subr.bf16.mxu1 %v2262_v12 }
  0x73   :  { %v2248_v13 = vld [vmem:[#allocation5 + $0x80] ss:$16 sps:$4 sm:$0xff]   ;;  %v2249_v15 = vld [vmem:[#allocation5 + $0xa4] ss:$16 sps:$4 sm:$0xff]   ;;  %v2265_v16 = vld [vmem:[#allocation5 + $0x4c] ss:$16 sps:$4 sm:$0xff]  }
  0x74   :  { %v2251_v17 = vld [vmem:[#allocation5 + $0xa0] ss:$16 sps:$4 sm:$0xff]   ;;  %v2267_v18 = vld [vmem:[#allocation5 + $0x48] ss:$16 sps:$4 sm:$0xff]   ;;  %v2252_v19 = vld [vmem:[#allocation5 + $0xc4] ss:$16 sps:$4 sm:$0xff]  }
  0x75   :  { %347 = vmatpush1.bf16.msra.mxu0 %v2239_v4  ;;  %390 = vmatpush1.bf16.msra.mxu1 %v2264_v14  ;;  %v2268_v20 = vld [vmem:[#allocation5 + $0x6c] ss:$16 sps:$4 sm:$0xff]   ;;  %v2254_v21 = vld [vmem:[#allocation5 + $0xc0] ss:$16 sps:$4 sm:$0xff]   ;;  %v2270_v22 = vld [vmem:[#allocation5 + $0x68] ss:$16 sps:$4 sm:$0xff]  }
  0x76   :  { %348 = vmatprep.subr.bf16.mxu0 %v2240_v5  ;;  %391 = vmatprep.subr.bf16.mxu1 %v2265_v16  ;;  %v2255_v23 = vld [vmem:[#allocation5 + $0xe4] ss:$16 sps:$4 sm:$0xff]   ;;  %v2271_v24 = vld [vmem:[#allocation5 + $0x8c] ss:$16 sps:$4 sm:$0xff]   ;;  %v2257_v25 = vld [vmem:[#allocation5 + $0xe0] ss:$16 sps:$4 sm:$0xff]  }
  0x77   :  { %v2273_v26 = vld [vmem:[#allocation5 + $0x88] ss:$16 sps:$4 sm:$0xff]   ;;  %v2274_v27 = vld [vmem:[#allocation5 + $0xac] ss:$16 sps:$4 sm:$0xff]   ;;  %v2379_v3 = vld [vmem:[#allocation8] ss:$16 sps:$4 sm:$0xff]  }
  0x78   :  { %v2285_v28 = vld [vmem:[#allocation7 + $0x4] ss:$8 sps:$4 sm:$0xff]   ;;  %v2276_v30 = vld [vmem:[#allocation5 + $0xa8] ss:$16 sps:$4 sm:$0xff]   ;;  %v2288_v33 = vld [vmem:[#allocation7 + $0x14] ss:$8 sps:$4 sm:$0xff]  }
  0x79   :  { %349 = vmatpush1.bf16.msra.mxu0 %v2242_v6  ;;  %392 = vmatpush1.bf16.msra.mxu1 %v2267_v18  ;;  %v2283_v31 = vld [vmem:[#allocation7] ss:$8 sps:$4 sm:$0xff]   ;;  %v2277_v32 = vld [vmem:[#allocation5 + $0xcc] ss:$16 sps:$4 sm:$0xff]   ;;  %v2286_v35 = vld [vmem:[#allocation7 + $0x10] ss:$8 sps:$4 sm:$0xff]  }
  0x7a   :  { %350 = vmatprep.subr.bf16.mxu0 %v2243_v7  ;;  %393 = vmatprep.subr.bf16.mxu1 %v2268_v20  ;;  %v2279_v34 = vld [vmem:[#allocation5 + $0xc8] ss:$16 sps:$4 sm:$0xff]   ;;  %v2280_v36 = vld [vmem:[#allocation5 + $0xec] ss:$16 sps:$4 sm:$0xff]   ;;  %v2381_v4 = vld [vmem:[#allocation8 + $0x4] ss:$16 sps:$4 sm:$0xff]  }
  0x7b   :  { %v2291_v37 = vld [vmem:[#allocation7 + $0x24] ss:$8 sps:$4 sm:$0xff]   ;;  %v2282_v38 = vld [vmem:[#allocation5 + $0xe8] ss:$16 sps:$4 sm:$0xff]   ;;  %v2294_v40 = vld [vmem:[#allocation7 + $0x34] ss:$8 sps:$4 sm:$0xff]  }
  0x7c   :  { %v2289_v39 = vld [vmem:[#allocation7 + $0x20] ss:$8 sps:$4 sm:$0xff]   ;;  %v2292_v41 = vld [vmem:[#allocation7 + $0x30] ss:$8 sps:$4 sm:$0xff]   ;;  %v2297_v42 = vld [vmem:[#allocation7 + $0x44] ss:$8 sps:$4 sm:$0xff]  }
  0x7d   :  { %351 = vmatpush1.bf16.msra.mxu0 %v2245_v8  ;;  %394 = vmatpush1.bf16.msra.mxu1 %v2270_v22  ;;  %v2295_v43 = vld [vmem:[#allocation7 + $0x40] ss:$8 sps:$4 sm:$0xff]   ;;  %v2300_v44 = vld [vmem:[#allocation7 + $0x54] ss:$8 sps:$4 sm:$0xff]   ;;  %v2298_v45 = vld [vmem:[#allocation7 + $0x50] ss:$8 sps:$4 sm:$0xff]  }
  0x7e   :  { %352 = vmatprep.subr.bf16.mxu0 %v2246_v9  ;;  %395 = vmatprep.subr.bf16.mxu1 %v2271_v24  ;;  %v2303_v46 = vld [vmem:[#allocation7 + $0x64] ss:$8 sps:$4 sm:$0xff]   ;;  %v2301_v47 = vld [vmem:[#allocation7 + $0x60] ss:$8 sps:$4 sm:$0xff]   ;;  %v2306_v48 = vld [vmem:[#allocation7 + $0x74] ss:$8 sps:$4 sm:$0xff]   ;;  %v158_v24 = vlaneseq }
  0x7f   :  { %v2304_v49 = vld [vmem:[#allocation7 + $0x70] ss:$8 sps:$4 sm:$0xff]   ;;  %v2309_v50 = vld [vmem:[#allocation7 + $0x84] ss:$8 sps:$4 sm:$0xff]   ;;  %v2307_v51 = vld [vmem:[#allocation7 + $0x80] ss:$8 sps:$4 sm:$0xff]  }
  0x80   :  { %v2312_v52 = vld [vmem:[#allocation7 + $0x94] ss:$8 sps:$4 sm:$0xff]   ;;  %v2310_v53 = vld [vmem:[#allocation7 + $0x90] ss:$8 sps:$4 sm:$0xff]   ;;  %v2315_v54 = vld [vmem:[#allocation7 + $0xa4] ss:$8 sps:$4 sm:$0xff]  }
  0x81   :  { %353 = vmatpush1.bf16.msra.mxu0 %v2248_v13  ;;  %396 = vmatpush1.bf16.msra.mxu1 %v2273_v26  ;;  %v2313_v55 = vld [vmem:[#allocation7 + $0xa0] ss:$8 sps:$4 sm:$0xff]   ;;  %v2318_v56 = vld [vmem:[#allocation7 + $0xb4] ss:$8 sps:$4 sm:$0xff]   ;;  %v2316_v57 = vld [vmem:[#allocation7 + $0xb0] ss:$8 sps:$4 sm:$0xff]  }
  0x82   :  { %354 = vmatprep.subr.bf16.mxu0 %v2249_v15  ;;  %397 = vmatprep.subr.bf16.mxu1 %v2274_v27  ;;  %v2321_v58 = vld [vmem:[#allocation7 + $0xc4] ss:$8 sps:$4 sm:$0xff]   ;;  %v2319_v59 = vld [vmem:[#allocation7 + $0xc0] ss:$8 sps:$4 sm:$0xff]   ;;  %v2324_v60 = vld [vmem:[#allocation7 + $0xd4] ss:$8 sps:$4 sm:$0xff]  }
  0x83   :  { %v2322_v61 = vld [vmem:[#allocation7 + $0xd0] ss:$8 sps:$4 sm:$0xff]   ;;  %v2327_v62 = vld [vmem:[#allocation7 + $0xe4] ss:$8 sps:$4 sm:$0xff]   ;;  %v2325_v63 = vld [vmem:[#allocation7 + $0xe0] ss:$8 sps:$4 sm:$0xff]  }
  0x84   :  { %v2330_v0 = vld [vmem:[#allocation7 + $0xf4] ss:$8 sps:$4 sm:$0xff]   ;;  %v2328_v1 = vld [vmem:[#allocation7 + $0xf0] ss:$8 sps:$4 sm:$0xff]   ;;  %v2333_v2 = vld [vmem:[#allocation7 + $0x104] ss:$8 sps:$4 sm:$0xff]  }
  0x85   :  { %355 = vmatpush1.bf16.msra.mxu0 %v2251_v17  ;;  %398 = vmatpush1.bf16.msra.mxu1 %v2276_v30  ;;  %v2384_v5 = vld [vmem:[#allocation8 + $0x24] ss:$16 sps:$4 sm:$0xff]   ;;  %v2382_v6 = vld [vmem:[#allocation8 + $0x20] ss:$16 sps:$4 sm:$0xff]   ;;  %v2854_v27 = vshrl.u32 %v158_v24, 7  ;;  %vm2701_vm0 = vmmov 0  }
  0x86   :  { %356 = vmatprep.subr.bf16.mxu0 %v2252_v19  ;;  %399 = vmatprep.subr.bf16.mxu1 %v2277_v32  ;;  %v2387_v7 = vld [vmem:[#allocation8 + $0x44] ss:$16 sps:$4 sm:$0xff]   ;;  %v2385_v8 = vld [vmem:[#allocation8 + $0x40] ss:$16 sps:$4 sm:$0xff]  }
  0x87   :  { %v2390_v9 = vld [vmem:[#allocation8 + $0x64] ss:$16 sps:$4 sm:$0xff]   ;;  %v2388_v10 = vld [vmem:[#allocation8 + $0x60] ss:$16 sps:$4 sm:$0xff]   ;;  %v2857_v30 = vsub.s32 0, %v2854_v27  ;;  %v2863_v32 = vsub.s32 1, %v2854_v27 }
  0x88   :  { %v2393_v11 = vld [vmem:[#allocation8 + $0x84] ss:$16 sps:$4 sm:$0xff]   ;;  %v2391_v12 = vld [vmem:[#allocation8 + $0x80] ss:$16 sps:$4 sm:$0xff]  }
  0x89   :  { %357 = vmatpush1.bf16.msra.mxu0 %v2254_v21  ;;  %400 = vmatpush1.bf16.msra.mxu1 %v2279_v34  ;;  %v2396_v13 = vld [vmem:[#allocation8 + $0xa4] ss:$16 sps:$4 sm:$0xff]   ;;  %v2394_v14 = vld [vmem:[#allocation8 + $0xa0] ss:$16 sps:$4 sm:$0xff]  }
  0x8a   :  { %358 = vmatprep.subr.bf16.mxu0 %v2255_v23  ;;  %401 = vmatprep.subr.bf16.mxu1 %v2280_v36  ;;  %v2399_v15 = vld [vmem:[#allocation8 + $0xc4] ss:$16 sps:$4 sm:$0xff]   ;;  %v2397_v16 = vld [vmem:[#allocation8 + $0xc0] ss:$16 sps:$4 sm:$0xff]  }
  0x8b   :  { %v2402_v17 = vld [vmem:[#allocation8 + $0xe4] ss:$16 sps:$4 sm:$0xff]   ;;  %v2400_v18 = vld [vmem:[#allocation8 + $0xe0] ss:$16 sps:$4 sm:$0xff]  }
  0x8c   :  { %v2405_v19 = vld [vmem:[#allocation8 + $0x104] ss:$16 sps:$4 sm:$0xff]   ;;  %v2403_v20 = vld [vmem:[#allocation8 + $0x100] ss:$16 sps:$4 sm:$0xff]  }
  0x8d   :  { %359 = vmatpush1.bf16.msra.mxu0 %v2257_v25  ;;  %402 = vmatpush1.bf16.msra.mxu1 %v2282_v38  ;;  %v2408_v21 = vld [vmem:[#allocation8 + $0x124] ss:$16 sps:$4 sm:$0xff]   ;;  %v2406_v22 = vld [vmem:[#allocation8 + $0x120] ss:$16 sps:$4 sm:$0xff]  }
  0x8e   :  { %838 = vmatprep.subr.bf16.mxu0 %v2285_v28  ;;  %1336 = vmatprep.subr.bf16.mxu1 %v2381_v4  ;;  %v2411_v23 = vld [vmem:[#allocation8 + $0x144] ss:$16 sps:$4 sm:$0xff]   ;;  %v2409_v25 = vld [vmem:[#allocation8 + $0x140] ss:$16 sps:$4 sm:$0xff]  }
  0x8f   :  { %v2414_v26 = vld [vmem:[#allocation8 + $0x164] ss:$16 sps:$4 sm:$0xff]   ;;  %v2412_v28 = vld [vmem:[#allocation8 + $0x160] ss:$16 sps:$4 sm:$0xff]  }
  0x90   :  { %377 = vmatmul.mubr.bf16.vlgmr.msra.gmra.mrb[0].mxu0 %v2258_v29  ;;  %420 = vmatmul.mubr.bf16.vlgmr.msra.gmra.mrb[0].mxu1 %v2258_v29  ;;  %v2417_v29 = vld [vmem:[#allocation8 + $0x184] ss:$16 sps:$4 sm:$0xff]   ;;  %v2337_v4 = vld [vmem:[#allocation7 + $0x120] ss:$8 sps:$4 sm:$0xff]   ;;  %v2358_v24 = vld [vmem:[#allocation7 + $0x190] ss:$8 sps:$4 sm:$0xff]  }
  0x91   :  { %839 = vmatpush1.bf16.msra.mxu0 %v2283_v31  ;;  %1337 = vmatpush1.bf16.msra.mxu1 %v2379_v3  ;;  %v156_v31 = vld [vmem:[%s2914_s2] sm:$0xf]  ;;  %v2420_v34 = vld [vmem:[#allocation8 + $0x1a4] ss:$16 sps:$4 sm:$0xff]  }
  0x92   :  { %840 = vmatprep.subr.bf16.mxu0 %v2288_v33  ;;  %1338 = vmatprep.subr.bf16.mxu1 %v2384_v5  ;;  %v2415_v33 = vld [vmem:[#allocation8 + $0x180] ss:$16 sps:$4 sm:$0xff]   ;;  %v165_v36 = vrot.slane %v156_v31, %v2863_v32 }
  0x95   :  { %841 = vmatpush1.bf16.msra.mxu0 %v2286_v35  ;;  %1339 = vmatpush1.bf16.msra.mxu1 %v2382_v6  ;;  %v161_v35 = vrot.slane %v156_v31, %v2857_v30 }
  0x96   :  { %842 = vmatprep.subr.bf16.mxu0 %v2291_v37  ;;  %1340 = vmatprep.subr.bf16.mxu1 %v2387_v7  ;;  %v2418_v37 = vld [vmem:[#allocation8 + $0x1a0] ss:$16 sps:$4 sm:$0xff]   ;;  %v2342_v7 = vld [vmem:[#allocation7 + $0x134] ss:$8 sps:$4 sm:$0xff]  }
  0x99   :  { %843 = vmatpush1.bf16.msra.mxu0 %v2289_v39  ;;  %1341 = vmatpush1.bf16.msra.mxu1 %v2385_v8 }
  0x9a   :  { %844 = vmatprep.subr.bf16.mxu0 %v2294_v40  ;;  %1342 = vmatprep.subr.bf16.mxu1 %v2390_v9 }
  0x9d   :  { %845 = vmatpush1.bf16.msra.mxu0 %v2292_v41  ;;  %1343 = vmatpush1.bf16.msra.mxu1 %v2388_v10 }
  0x9e   :  { %846 = vmatprep.subr.bf16.mxu0 %v2297_v42  ;;  %1344 = vmatprep.subr.bf16.mxu1 %v2393_v11  ;;  %v2340_v11 = vld [vmem:[#allocation7 + $0x130] ss:$8 sps:$4 sm:$0xff]  }
  0xa1   :  { %847 = vmatpush1.bf16.msra.mxu0 %v2295_v43  ;;  %1345 = vmatpush1.bf16.msra.mxu1 %v2391_v12 }
  0xa2   :  { %848 = vmatprep.subr.bf16.mxu0 %v2300_v44  ;;  %1346 = vmatprep.subr.bf16.mxu1 %v2396_v13  ;;  %v2345_v13 = vld [vmem:[#allocation7 + $0x144] ss:$8 sps:$4 sm:$0xff]  }
  0xa5   :  { %849 = vmatpush1.bf16.msra.mxu0 %v2298_v45  ;;  %1347 = vmatpush1.bf16.msra.mxu1 %v2394_v14  ;;  %v2343_v14 = vld [vmem:[#allocation7 + $0x140] ss:$8 sps:$4 sm:$0xff]  }
  0xa6   :  { %850 = vmatprep.subr.bf16.mxu0 %v2303_v46  ;;  %1348 = vmatprep.subr.bf16.mxu1 %v2399_v15  ;;  %v2348_v15 = vld [vmem:[#allocation7 + $0x154] ss:$8 sps:$4 sm:$0xff]  }
  0xa9   :  { %851 = vmatpush1.bf16.msra.mxu0 %v2301_v47  ;;  %1349 = vmatpush1.bf16.msra.mxu1 %v2397_v16  ;;  %v2346_v16 = vld [vmem:[#allocation7 + $0x150] ss:$8 sps:$4 sm:$0xff]  }
  0xaa   :  { %852 = vmatprep.subr.bf16.mxu0 %v2306_v48  ;;  %1350 = vmatprep.subr.bf16.mxu1 %v2402_v17  ;;  %v168_v48 = vsub.s32 2, %v2854_v27  ;;  %v2351_v17 = vld [vmem:[#allocation7 + $0x164] ss:$8 sps:$4 sm:$0xff]  }
  0xad   :  { %853 = vmatpush1.bf16.msra.mxu0 %v2304_v49  ;;  %1351 = vmatpush1.bf16.msra.mxu1 %v2400_v18  ;;  %v2349_v18 = vld [vmem:[#allocation7 + $0x160] ss:$8 sps:$4 sm:$0xff]  }
  0xae   :  { %854 = vmatprep.subr.bf16.mxu0 %v2309_v50  ;;  %1352 = vmatprep.subr.bf16.mxu1 %v2405_v19  ;;  %v2354_v19 = vld [vmem:[#allocation7 + $0x174] ss:$8 sps:$4 sm:$0xff]  }
  0xb1   :  { %855 = vmatpush1.bf16.msra.mxu0 %v2307_v51  ;;  %1353 = vmatpush1.bf16.msra.mxu1 %v2403_v20  ;;  %v172_v51 = vsub.s32 3, %v2854_v27  ;;  %v2352_v20 = vld [vmem:[#allocation7 + $0x170] ss:$8 sps:$4 sm:$0xff]   ;;  %v2508_v27 = vld [vmem:[#allocation11 + $0x8] sm:$0xff]  }
  0xb2   :  { %856 = vmatprep.subr.bf16.mxu0 %v2312_v52  ;;  %1354 = vmatprep.subr.bf16.mxu1 %v2408_v21  ;;  %v2357_v21 = vld [vmem:[#allocation7 + $0x184] ss:$8 sps:$4 sm:$0xff]  }
  0xb5   :  { %857 = vmatpush1.bf16.msra.mxu0 %v2310_v53  ;;  %1355 = vmatpush1.bf16.msra.mxu1 %v2406_v22  ;;  %v2355_v22 = vld [vmem:[#allocation7 + $0x180] ss:$8 sps:$4 sm:$0xff]  }
  0xb6   :  { %858 = vmatprep.subr.bf16.mxu0 %v2315_v54  ;;  %1356 = vmatprep.subr.bf16.mxu1 %v2411_v23  ;;  %v2331_v54 = vld [vmem:[#allocation7 + $0x100] ss:$8 sps:$4 sm:$0xff]   ;;  %v2360_v23 = vld [vmem:[#allocation7 + $0x194] ss:$8 sps:$4 sm:$0xff]  }
  0xb9   :  { %859 = vmatpush1.bf16.msra.mxu0 %v2313_v55  ;;  %1357 = vmatpush1.bf16.msra.mxu1 %v2409_v25  ;;  %v2336_v55 = vld [vmem:[#allocation7 + $0x114] ss:$8 sps:$4 sm:$0xff]   ;;  %v2363_v25 = vld [vmem:[#allocation7 + $0x1a4] ss:$8 sps:$4 sm:$0xff]  }
  0xba   :  { %860 = vmatprep.subr.bf16.mxu0 %v2318_v56  ;;  %1358 = vmatprep.subr.bf16.mxu1 %v2414_v26  ;;  %v169_v56 = vrot.slane %v156_v31, %v168_v48  ;;  %v2361_v26 = vld [vmem:[#allocation7 + $0x1a0] ss:$8 sps:$4 sm:$0xff]  }
  0xbd   :  { %861 = vmatpush1.bf16.msra.mxu0 %v2316_v57  ;;  %1359 = vmatpush1.bf16.msra.mxu1 %v2412_v28  ;;  %v173_v57 = vrot.slane %v156_v31, %v172_v51  ;;  %v2366_v28 = vld [vmem:[#allocation7 + $0x1b4] ss:$8 sps:$4 sm:$0xff]   ;;  %v2369_v31 = vld [vmem:[#allocation7 + $0x1c4] ss:$8 sps:$4 sm:$0xff]  }
  0xbe   :  { %862 = vmatprep.subr.bf16.mxu0 %v2321_v58  ;;  %1360 = vmatprep.subr.bf16.mxu1 %v2417_v29  ;;  %v2334_v58 = vld [vmem:[#allocation7 + $0x110] ss:$8 sps:$4 sm:$0xff]  }
  0xbf   :  { %v2364_v29 = vld [vmem:[#allocation7 + $0x1b0] ss:$8 sps:$4 sm:$0xff]  }
  0xc1   :  { %863 = vmatpush1.bf16.msra.mxu0 %v2319_v59  ;;  %1361 = vmatpush1.bf16.msra.mxu1 %v2415_v33  ;;  %v2367_v33 = vld [vmem:[#allocation7 + $0x1c0] ss:$8 sps:$4 sm:$0xff]  }
  0xc2   :  { %864 = vmatprep.subr.bf16.mxu0 %v2324_v60  ;;  %1362 = vmatprep.subr.bf16.mxu1 %v2420_v34  ;;  %v2339_v60 = vld [vmem:[#allocation7 + $0x124] ss:$8 sps:$4 sm:$0xff]   ;;  %v2372_v34 = vld [vmem:[#allocation7 + $0x1d4] ss:$8 sps:$4 sm:$0xff]  }
  0xc5   :  { %865 = vmatpush1.bf16.msra.mxu0 %v2322_v61  ;;  %1363 = vmatpush1.bf16.msra.mxu1 %v2418_v37  ;;  %v2373_v37 = vld [vmem:[#allocation7 + $0x1e0] ss:$8 sps:$4 sm:$0xff]  }
  0xc6   :  { %866 = vmatprep.subr.bf16.mxu0 %v2327_v62 }
  0xc9   :  { %867 = vmatpush1.bf16.msra.mxu0 %v2325_v63 }
  0xca   :  { %868 = vmatprep.subr.bf16.mxu0 %v2330_v0 }
  0xcd   :  { %869 = vmatpush1.bf16.msra.mxu0 %v2328_v1 }
  0xce   :  { %881 = vmatprep.subr.bf16.mxu0 %v2333_v2 }
 0x163   :  { %v378_v38 = vpop.f32.mrb[0].mxu0  ;;  %v421_v59 = vpop.f32.mrb[0].mxu1 }
 0x164   :  { %v379_v39 = vadd.f32 %v378_v38, %v161_v35  ;;  %v380_v40 = vpop.f32.mrb[1].mxu0  ;;  %v422_v61 = vadd.f32 %v421_v59, %v169_v56  ;;  %v423_v62 = vpop.f32.mrb[1].mxu1  ;;  %v2378_v38 = vld [vmem:[#allocation7 + $0x1f4] ss:$8 sps:$4 sm:$0xff]  }
 0x165   :  { %v381_v41 = vadd.f32 %v380_v40, %v165_v36  ;;  %v382_v42 = vpop.f32.mrb[2].mxu0  ;;  %v424_v63 = vadd.f32 %v423_v62, %v173_v57  ;;  %v425_v0 = vpop.f32.mrb[2].mxu1  ;;  %v2423_v40 = vld [vmem:[#allocation8 + $0x1c4] ss:$16 sps:$4 sm:$0xff]  }
 0x166   :  { %v383_v43 = vadd.f32 %v382_v42, %v161_v35  ;;  %v384_v44 = vpop.f32.mrb[3].mxu0  ;;  %v430_v46 = vmax.f32 %v379_v39, 0.0  ;;  %v432_v1 = vmax.f32 %v422_v61, 0.0  ;;  %v426_v2 = vadd.f32 %v425_v0, %v169_v56  ;;  %v427_v3 = vpop.f32.mrb[3].mxu1  ;;  %v2370_v35 = vld [vmem:[#allocation7 + $0x1d0] ss:$8 sps:$4 sm:$0xff]   ;;  %1364 = vmatprep.subr.bf16.mxu1 %v2423_v40 }
 0x167   :  { %v385_v45 = vadd.f32 %v384_v44, %v165_v36  ;;  %v431_v49 = vmax.f32 %v381_v41, 0.0  ;;  %v433_v5 = vmax.f32 %v424_v63, 0.0  ;;  %v428_v6 = vadd.f32 %v427_v3, %v173_v57  ;;  %v2375_v36 = vld [vmem:[#allocation7 + $0x1e4] ss:$8 sps:$4 sm:$0xff]   ;;  %v2376_v39 = vld [vmem:[#allocation7 + $0x1f0] ss:$8 sps:$4 sm:$0xff]  }
 0x168   :  { %v434_v47 = vmax.f32 %v383_v43, 0.0  ;;  %v436_v8 = vmax.f32 %v426_v2, 0.0  ;;  %v2421_v41 = vld [vmem:[#allocation8 + $0x1c0] ss:$16 sps:$4 sm:$0xff]   ;;  %v2426_v42 = vld [vmem:[#allocation8 + $0x1e4] ss:$16 sps:$4 sm:$0xff]  }
 0x169   :  { %v435_v50 = vmax.f32 %v385_v45, 0.0  ;;  %v437_v9 = vmax.f32 %v428_v6, 0.0  ;;  %1365 = vmatpush1.bf16.msra.mxu1 %v2421_v41  ;;  %v2424_v43 = vld [vmem:[#allocation8 + $0x1e0] ss:$16 sps:$4 sm:$0xff]   ;;  %v2429_v44 = vld [vmem:[#allocation8 + $0xc] ss:$16 sps:$4 sm:$0xff]  }
 0x16a   :  { %v438_v52 = vpack.c.bf16 %v434_v47, %v430_v46  ;;  %v440_v10 = vpack.c.bf16 %v436_v8, %v432_v1  ;;  %1366 = vmatprep.subr.bf16.mxu1 %v2426_v42  ;;  %v2475_v45 = vld [vmem:[#allocation10 + $0x40] sm:$0xff]   ;;  %v2477_v47 = vld [vmem:[#allocation10 + $0x48] sm:$0xff]  }
 0x16b   :  { %v439_v53 = vpack.c.bf16 %v435_v50, %v431_v49  ;;  %v441_v12 = vpack.c.bf16 %v437_v9, %v433_v5  ;;  %v2476_v46 = vld [vmem:[#allocation10] sm:$0xff]   ;;  %v2478_v49 = vld [vmem:[#allocation10 + $0x8] sm:$0xff]   ;;  %v2479_v50 = vld [vmem:[#allocation10 + $0x50] sm:$0xff]  }
 0x16c   :  { %v2484_v56 = vld [vmem:[#allocation10 + $0x20] sm:$0xff]   ;;  %v2485_v57 = vld [vmem:[#allocation10 + $0x68] sm:$0xff]  }
 0x16d   :  { %870 = vmatprep.mubr.bf16.mxu0 %v439_v53  ;;  %1367 = vmatpush1.bf16.msra.mxu1 %v2424_v43  ;;  %v2481_v53 = vld [vmem:[#allocation10 + $0x58] sm:$0xff]  }
 0x16e   :  { %871 = vmatmul.mubr.bf16.vlgmr.msra.gmra.mrb[4].mxu0 %v438_v52  ;;  %1379 = vmatprep.subr.bf16.mxu1 %v2429_v44  ;;  %v2480_v52 = vld [vmem:[#allocation10 + $0x10] sm:$0xff]   ;;  %v2466_v40 = vld [vmem:[#allocation8 + $0x1a8] ss:$16 sps:$4 sm:$0xff]   ;;  %v2471_v41 = vld [vmem:[#allocation8 + $0x1cc] ss:$16 sps:$4 sm:$0xff]  }
 0x16f   :  { %882 = vmatpush1.bf16.msra.mxu0 %v2331_v54  ;;  %913 = vmatprep.mubr.bf16.mxu0 %v441_v12  ;;  %v2482_v54 = vld [vmem:[#allocation10 + $0x18] sm:$0xff]  }
 0x170   :  { %883 = vmatprep.subr.bf16.mxu0 %v2336_v55  ;;  %v2483_v55 = vld [vmem:[#allocation10 + $0x60] sm:$0xff]   ;;  %v2432_v12 = vld [vmem:[#allocation8 + $0x2c] ss:$16 sps:$4 sm:$0xff]   ;;  %v2469_v42 = vld [vmem:[#allocation8 + $0x1c8] ss:$16 sps:$4 sm:$0xff]  }
 0x171   :  { %v2474_v43 = vld [vmem:[#allocation8 + $0x1ec] ss:$16 sps:$4 sm:$0xff]   ;;  %v2472_v44 = vld [vmem:[#allocation8 + $0x1e8] ss:$16 sps:$4 sm:$0xff]  }
 0x173   :  { %884 = vmatpush1.bf16.msra.mxu0 %v2334_v58  ;;  %v506_v58 = vld [vmem:[%s2916_s4] sm:$0x3] }
 0x174   :  { %885 = vmatprep.subr.bf16.mxu0 %v2339_v60  ;;  %v511_v59 = vrot.slane %v506_v58, %v2857_v30  ;;  %v515_v60 = vrot.slane %v506_v58, %v2863_v32  ;;  %v2497_v58 = vld [vmem:[#allocation10 + $0xd8] sm:$0xff]  }
 0x177   :  { %886 = vmatpush1.bf16.msra.mxu0 %v2337_v4 }
 0x178   :  { %887 = vmatprep.subr.bf16.mxu0 %v2342_v7 }
 0x17b   :  { %888 = vmatpush1.bf16.msra.mxu0 %v2340_v11  ;;  %v2427_v11 = vld [vmem:[#allocation8 + $0x8] ss:$16 sps:$4 sm:$0xff]  }
 0x17c   :  { %889 = vmatprep.subr.bf16.mxu0 %v2345_v13  ;;  %v2430_v13 = vld [vmem:[#allocation8 + $0x28] ss:$16 sps:$4 sm:$0xff]  }
 0x17f   :  { %890 = vmatpush1.bf16.msra.mxu0 %v2343_v14  ;;  %v2435_v14 = vld [vmem:[#allocation8 + $0x4c] ss:$16 sps:$4 sm:$0xff]  }
 0x180   :  { %891 = vmatprep.subr.bf16.mxu0 %v2348_v15  ;;  %v2433_v15 = vld [vmem:[#allocation8 + $0x48] ss:$16 sps:$4 sm:$0xff]  }
 0x183   :  { %892 = vmatpush1.bf16.msra.mxu0 %v2346_v16  ;;  %v2438_v16 = vld [vmem:[#allocation8 + $0x6c] ss:$16 sps:$4 sm:$0xff]  }
 0x184   :  { %893 = vmatprep.subr.bf16.mxu0 %v2351_v17  ;;  %v2436_v17 = vld [vmem:[#allocation8 + $0x68] ss:$16 sps:$4 sm:$0xff]  }
 0x187   :  { %894 = vmatpush1.bf16.msra.mxu0 %v2349_v18  ;;  %v2441_v18 = vld [vmem:[#allocation8 + $0x8c] ss:$16 sps:$4 sm:$0xff]  }
 0x188   :  { %895 = vmatprep.subr.bf16.mxu0 %v2354_v19  ;;  %v2439_v19 = vld [vmem:[#allocation8 + $0x88] ss:$16 sps:$4 sm:$0xff]  }
 0x18b   :  { %896 = vmatpush1.bf16.msra.mxu0 %v2352_v20  ;;  %v2444_v20 = vld [vmem:[#allocation8 + $0xac] ss:$16 sps:$4 sm:$0xff]  }
 0x18c   :  { %897 = vmatprep.subr.bf16.mxu0 %v2357_v21  ;;  %v2442_v21 = vld [vmem:[#allocation8 + $0xa8] ss:$16 sps:$4 sm:$0xff]  }
 0x18f   :  { %898 = vmatpush1.bf16.msra.mxu0 %v2355_v22  ;;  %v2447_v22 = vld [vmem:[#allocation8 + $0xcc] ss:$16 sps:$4 sm:$0xff]  }
 0x190   :  { %899 = vmatprep.subr.bf16.mxu0 %v2360_v23  ;;  %v2445_v23 = vld [vmem:[#allocation8 + $0xc8] ss:$16 sps:$4 sm:$0xff]  }
 0x193   :  { %900 = vmatpush1.bf16.msra.mxu0 %v2358_v24  ;;  %v2450_v24 = vld [vmem:[#allocation8 + $0xec] ss:$16 sps:$4 sm:$0xff]  }
 0x194   :  { %901 = vmatprep.subr.bf16.mxu0 %v2363_v25  ;;  %v2448_v25 = vld [vmem:[#allocation8 + $0xe8] ss:$16 sps:$4 sm:$0xff]  }
 0x197   :  { %902 = vmatpush1.bf16.msra.mxu0 %v2361_v26  ;;  %v2453_v26 = vld [vmem:[#allocation8 + $0x10c] ss:$16 sps:$4 sm:$0xff]  }
 0x198   :  { %903 = vmatprep.subr.bf16.mxu0 %v2366_v28  ;;  %v2451_v28 = vld [vmem:[#allocation8 + $0x108] ss:$16 sps:$4 sm:$0xff]  }
 0x19b   :  { %904 = vmatpush1.bf16.msra.mxu0 %v2364_v29  ;;  %v2456_v29 = vld [vmem:[#allocation8 + $0x12c] ss:$16 sps:$4 sm:$0xff]  }
 0x19c   :  { %905 = vmatprep.subr.bf16.mxu0 %v2369_v31  ;;  %v2454_v31 = vld [vmem:[#allocation8 + $0x128] ss:$16 sps:$4 sm:$0xff]  }
 0x19f   :  { %906 = vmatpush1.bf16.msra.mxu0 %v2367_v33  ;;  %v2459_v33 = vld [vmem:[#allocation8 + $0x14c] ss:$16 sps:$4 sm:$0xff]  }
 0x1a0   :  { %907 = vmatprep.subr.bf16.mxu0 %v2372_v34  ;;  %v2457_v34 = vld [vmem:[#allocation8 + $0x148] ss:$16 sps:$4 sm:$0xff]  }
 0x1a3   :  { %908 = vmatpush1.bf16.msra.mxu0 %v2370_v35  ;;  %v2462_v35 = vld [vmem:[#allocation8 + $0x16c] ss:$16 sps:$4 sm:$0xff]  }
 0x1a4   :  { %909 = vmatprep.subr.bf16.mxu0 %v2375_v36  ;;  %v2460_v36 = vld [vmem:[#allocation8 + $0x168] ss:$16 sps:$4 sm:$0xff]  }
 0x1a7   :  { %910 = vmatpush1.bf16.msra.mxu0 %v2373_v37  ;;  %v2465_v37 = vld [vmem:[#allocation8 + $0x18c] ss:$16 sps:$4 sm:$0xff]  }
 0x1a8   :  { %911 = vmatprep.subr.bf16.mxu0 %v2378_v38  ;;  %v2463_v38 = vld [vmem:[#allocation8 + $0x188] ss:$16 sps:$4 sm:$0xff]  }
 0x1ab   :  { %912 = vmatpush1.bf16.msra.mxu0 %v2376_v39  ;;  %v2468_v39 = vld [vmem:[#allocation8 + $0x1ac] ss:$16 sps:$4 sm:$0xff]  }
 0x1ac   :  { %2137 = vmatprep.subr.bf16.mxu0 %v2475_v45  ;;  %v2486_v45 = vld [vmem:[#allocation10 + $0x28] sm:$0xff]  }
 0x1ae   :  { %914 = vmatmul.mubr.bf16.vlgmr.msra.gmra.mrb[4].mxu0 %v440_v10 }
 0x1af   :  { %2138 = vmatpush3.bf16.msra.mxu0 %v2476_v46  ;;  %v2487_v46 = vld [vmem:[#allocation10 + $0x70] sm:$0xff]  }
 0x1b0   :  { %2139 = vmatprep.subr.bf16.mxu0 %v2477_v47  ;;  %v2488_v47 = vld [vmem:[#allocation10 + $0x30] sm:$0xff]  }
 0x1b3   :  { %2140 = vmatpush3.bf16.msra.mxu0 %v2478_v49  ;;  %v2489_v49 = vld [vmem:[#allocation10 + $0x78] sm:$0xff]  }
 0x1b4   :  { %2141 = vmatprep.subr.bf16.mxu0 %v2479_v50  ;;  %v2490_v50 = vld [vmem:[#allocation10 + $0x38] sm:$0xff]  }
 0x1b7   :  { %2142 = vmatpush3.bf16.msra.mxu0 %v2480_v52  ;;  %v2491_v52 = vld [vmem:[#allocation10 + $0xc0] sm:$0xff]  }
 0x1b8   :  { %2143 = vmatprep.subr.bf16.mxu0 %v2481_v53  ;;  %v2492_v53 = vld [vmem:[#allocation10 + $0x80] sm:$0xff]  }
 0x1bb   :  { %2144 = vmatpush3.bf16.msra.mxu0 %v2482_v54  ;;  %v2493_v54 = vld [vmem:[#allocation10 + $0xc8] sm:$0xff]  }
 0x1bc   :  { %2145 = vmatprep.subr.bf16.mxu0 %v2483_v55  ;;  %v2494_v55 = vld [vmem:[#allocation10 + $0x88] sm:$0xff]  }
 0x1bf   :  { %2146 = vmatpush3.bf16.msra.mxu0 %v2484_v56  ;;  %v2495_v56 = vld [vmem:[#allocation10 + $0xd0] sm:$0xff]  }
 0x1c0   :  { %2147 = vmatprep.subr.bf16.mxu0 %v2485_v57  ;;  %v2496_v57 = vld [vmem:[#allocation10 + $0x90] sm:$0xff]  }
 0x1c3   :  { %2148 = vmatpush3.bf16.msra.mxu0 %v2486_v45 }
 0x1c4   :  { %2149 = vmatprep.subr.bf16.mxu0 %v2487_v46 }
 0x1c7   :  { %2150 = vmatpush3.bf16.msra.mxu0 %v2488_v47 }
 0x1c8   :  { %2151 = vmatprep.subr.bf16.mxu0 %v2489_v49 }
 0x1cb   :  { %2152 = vmatpush3.bf16.msra.mxu0 %v2490_v50 }
 0x281   :  { %v915_v61 = vpop.f32.mrb[4].mxu0 }
 0x282   :  { %v2210_v62 = vadd.f32 %v915_v61, %v511_v59  ;;  %v917_v63 = vpop.f32.mrb[5].mxu0  ;;  %v2500_v61 = vld [vmem:[#allocation10 + $0xa0] sm:$0xff]  }
 0x283   :  { %v2211_v0 = vadd.f32 %v917_v63, %v515_v60  ;;  %v919_v1 = vpop.f32.mrb[6].mxu0  ;;  %v2502_v63 = vld [vmem:[#allocation10 + $0xa8] sm:$0xff]  }
 0x284   :  { %v2212_v2 = vadd.f32 %v919_v1, %v511_v59  ;;  %v921_v3 = vpop.f32.mrb[7].mxu0  ;;  %v924_v5 = vmax.f32 %v2210_v62, 0.0  ;;  %v2498_v59 = vld [vmem:[#allocation10 + $0x98] sm:$0xff]   ;;  %v2501_v62 = vld [vmem:[#allocation10 + $0xe8] sm:$0xff]   ;;  %v2504_v1 = vld [vmem:[#allocation10 + $0xb0] sm:$0xff]  }
 0x285   :  { %v2213_v4 = vadd.f32 %v921_v3, %v515_v60  ;;  %v925_v7 = vmax.f32 %v2211_v0, 0.0  ;;  %v2499_v60 = vld [vmem:[#allocation10 + $0xe0] sm:$0xff]   ;;  %v2503_v0 = vld [vmem:[#allocation10 + $0xf0] sm:$0xff]   ;;  %v2506_v3 = vld [vmem:[#allocation10 + $0xb8] sm:$0xff]  }
 0x286   :  { %v926_v6 = vmax.f32 %v2212_v2, 0.0  ;;  %v2505_v2 = vld [vmem:[#allocation10 + $0xf8] sm:$0xff]  }
 0x287   :  { %v927_v8 = vmax.f32 %v2213_v4, 0.0  ;;  %v994_v4 = vld [vmem:[%s2918_s6] sm:$0xf] }
 0x288   :  { %v2878_v9 = vpack.c.bf16 %v926_v6, %v924_v5  ;;  %v999_v5 = vrot.slane %v994_v4, %v2857_v30  ;;  %v1003_v6 = vrot.slane %v994_v4, %v2863_v32  ;;  %v1007_v30 = vrot.slane %v994_v4, %v168_v48  ;;  %v2507_v48 = vld [vmem:[#allocation11] sm:$0xff]  }
 0x289   :  { %v929_v10 = vpack.c.bf16 %v927_v8, %v925_v7  ;;  %v1011_v32 = vrot.slane %v994_v4, %v172_v51  ;;  %v2509_v51 = vld [vmem:[#allocation11 + $0x10] sm:$0xff]  }
 0x28b   :  { %1368 = vmatprep.mubr.bf16.mxu1 %v929_v10 }
 0x28c   :  { %1369 = vmatmul.mubr.bf16.vlgmr.msra.gmra.mrb[4].mxu1 %v2878_v9 }
 0x28d   :  { %1380 = vmatpush1.bf16.msra.mxu1 %v2427_v11  ;;  %1411 = vmatprep.mubr.bf16.mxu1 %v929_v10 }
 0x28e   :  { %1381 = vmatprep.subr.bf16.mxu1 %v2432_v12 }
 0x291   :  { %1382 = vmatpush1.bf16.msra.mxu1 %v2430_v13 }
 0x292   :  { %1383 = vmatprep.subr.bf16.mxu1 %v2435_v14 }
 0x295   :  { %1384 = vmatpush1.bf16.msra.mxu1 %v2433_v15 }
 0x296   :  { %1385 = vmatprep.subr.bf16.mxu1 %v2438_v16 }
 0x299   :  { %1386 = vmatpush1.bf16.msra.mxu1 %v2436_v17 }
 0x29a   :  { %1387 = vmatprep.subr.bf16.mxu1 %v2441_v18 }
 0x29d   :  { %1388 = vmatpush1.bf16.msra.mxu1 %v2439_v19 }
 0x29e   :  { %1389 = vmatprep.subr.bf16.mxu1 %v2444_v20 }
 0x2a1   :  { %1390 = vmatpush1.bf16.msra.mxu1 %v2442_v21 }
 0x2a2   :  { %1391 = vmatprep.subr.bf16.mxu1 %v2447_v22 }
 0x2a5   :  { %1392 = vmatpush1.bf16.msra.mxu1 %v2445_v23 }
 0x2a6   :  { %1393 = vmatprep.subr.bf16.mxu1 %v2450_v24 }
 0x2a9   :  { %1394 = vmatpush1.bf16.msra.mxu1 %v2448_v25 }
 0x2aa   :  { %1395 = vmatprep.subr.bf16.mxu1 %v2453_v26 }
 0x2ad   :  { %1396 = vmatpush1.bf16.msra.mxu1 %v2451_v28 }
 0x2ae   :  { %1397 = vmatprep.subr.bf16.mxu1 %v2456_v29 }
 0x2b1   :  { %1398 = vmatpush1.bf16.msra.mxu1 %v2454_v31 }
 0x2b2   :  { %1399 = vmatprep.subr.bf16.mxu1 %v2459_v33 }
 0x2b5   :  { %1400 = vmatpush1.bf16.msra.mxu1 %v2457_v34 }
 0x2b6   :  { %1401 = vmatprep.subr.bf16.mxu1 %v2462_v35 }
 0x2b9   :  { %1402 = vmatpush1.bf16.msra.mxu1 %v2460_v36 }
 0x2ba   :  { %1403 = vmatprep.subr.bf16.mxu1 %v2465_v37 }
 0x2bd   :  { %1404 = vmatpush1.bf16.msra.mxu1 %v2463_v38  ;;  %v2700_v38 = vmov 0.0  }
 0x2be   :  { %1405 = vmatprep.subr.bf16.mxu1 %v2468_v39  ;;  %2190 = vmatprep.subr.bf16.mxu0 %v2700_v38  ;;  %v2510_v39 = vld [vmem:[#allocation11 + $0x18] sm:$0xff]  }
 0x2c1   :  { %1406 = vmatpush1.bf16.msra.mxu1 %v2466_v40  ;;  %v2511_v40 = vld [vmem:[#allocation11 + $0x20] sm:$0xff]  }
 0x2c2   :  { %1407 = vmatprep.subr.bf16.mxu1 %v2471_v41  ;;  %v2512_v41 = vld [vmem:[#allocation11 + $0x28] sm:$0xff]  }
 0x2c5   :  { %1408 = vmatpush1.bf16.msra.mxu1 %v2469_v42  ;;  %v2513_v42 = vld [vmem:[#allocation11 + $0x30] sm:$0xff]  }
 0x2c6   :  { %1409 = vmatprep.subr.bf16.mxu1 %v2474_v43  ;;  %v2514_v43 = vld [vmem:[#allocation11 + $0x38] sm:$0xff]  }
 0x2c9   :  { %1410 = vmatpush1.bf16.msra.mxu1 %v2472_v44 }
 0x2ca   :  { %2159 = vmatprep.subr.bf16.mxu1 %v2491_v52  ;;  %v2095_v52 = vld [vmem:[%s2920_s8] ss:$0 sm:$0xff]  ;;  %s2702_s8 = smov [#allocation13]  }
 0x2cc   :  { %1412 = vmatmul.mubr.bf16.vlgmr.msra.gmra.mrb[8].mxu1 %v2878_v9 }
 0x2cd   :  { %2160 = vmatpush3.bf16.msra.mxu1 %v2492_v53 }
 0x2ce   :  { %2161 = vmatprep.subr.bf16.mxu1 %v2493_v54 }
 0x2d1   :  { %2162 = vmatpush3.bf16.msra.mxu1 %v2494_v55 }
 0x2d2   :  { %2163 = vmatprep.subr.bf16.mxu1 %v2495_v56 }
 0x2d5   :  { %2164 = vmatpush3.bf16.msra.mxu1 %v2496_v57 }
 0x2d6   :  { %2165 = vmatprep.subr.bf16.mxu1 %v2497_v58 }
 0x2d9   :  { %2166 = vmatpush3.bf16.msra.mxu1 %v2498_v59 }
 0x2da   :  { %2167 = vmatprep.subr.bf16.mxu1 %v2499_v60 }
 0x2dd   :  { %2168 = vmatpush3.bf16.msra.mxu1 %v2500_v61 }
 0x2de   :  { %2169 = vmatprep.subr.bf16.mxu1 %v2501_v62 }
 0x2e1   :  { %2170 = vmatpush3.bf16.msra.mxu1 %v2502_v63 }
 0x2e2   :  { %2171 = vmatprep.subr.bf16.mxu1 %v2503_v0 }
 0x2e5   :  { %2172 = vmatpush3.bf16.msra.mxu1 %v2504_v1 }
 0x2e6   :  { %2173 = vmatprep.subr.bf16.mxu1 %v2505_v2  ;;  %v2128_v2 = vld [vmem:[%s2922_s10] ss:$0 sm:$0xff]  ;;  %s1919_s10 = sshll.u32 %s2702_s8, 4  ;;  %s1920_s10 = int_to_ptr.vmem [resolvable:$true] %s1919_s10 }
 0x2e7   :  { %s2655_s22 = scalar_lea.vmem %s1920_s10, 256  ;;  %p2660_p7 = scmp.lt.s32.totalorder %s1920_s10, %s1920_s10 }
 0x2e8   :  { %p2656_p6 = scmp.ne.s32.totalorder %s1920_s10, %s2655_s22  ;;  %p2661_p8 = scmp.lt.s32.totalorder %s2655_s22, %s2655_s22 }
 0x2e9   :  { %2174 = vmatpush3.bf16.msra.mxu1 %v2506_v3 }
 0x2ea   :  { %p2662_p9 = por %p2661_p8, %p2660_p7 }
 0x2ec   :  { %p2663_p10 = pnand %p2662_p9, %p2656_p6 }
 0x35f   :  { %v1370_v7 = vpop.f32.mrb[4].mxu1 }
 0x360   :  { %v1371_v8 = vadd.f32 %v1370_v7, %v999_v5  ;;  %v1372_v9 = vpop.f32.mrb[5].mxu1 }
 0x361   :  { %v1373_v10 = vadd.f32 %v1372_v9, %v1003_v6  ;;  %v1374_v11 = vpop.f32.mrb[6].mxu1 }
 0x362   :  { %v1375_v12 = vadd.f32 %v1374_v11, %v999_v5  ;;  %v1376_v13 = vpop.f32.mrb[7].mxu1  ;;  %v1422_v15 = vmax.f32 %v1371_v8, 0.0 }
 0x363   :  { %v1377_v14 = vadd.f32 %v1376_v13, %v1003_v6  ;;  %v1423_v17 = vmax.f32 %v1373_v10, 0.0 }
 0x364   :  { %v1426_v16 = vmax.f32 %v1375_v12, 0.0 }
 0x365   :  { %v1427_v18 = vmax.f32 %v1377_v14, 0.0 }
 0x366   :  { %v1430_v19 = vpack.c.bf16 %v1426_v16, %v1422_v15 }
 0x367   :  { %v1431_v20 = vpack.c.bf16 %v1427_v18, %v1423_v17 }
 0x369   :  { %1729 = vmatprep.mubr.bf16.mxu0 %v1431_v20 }
 0x36a   :  { %1730 = vmatmul.mubr.bf16.vlgmr.msra.gmra.mrb[8].mxu0 %v1430_v19 }
 0x36b   :  { %2191 = vmatpush3.bf16.msra.mxu0 %v2507_v48  ;;  %2206 = vmatprep.mubr.msk.bf16.mxu0 %vm2701_vm0, %v2700_v38 }
 0x36c   :  { %2192 = vmatprep.subr.bf16.mxu0 %v2700_v38 }
 0x36f   :  { %2193 = vmatpush3.bf16.msra.mxu0 %v2508_v27 }
 0x370   :  { %2194 = vmatprep.subr.bf16.mxu0 %v2700_v38 }
 0x373   :  { %2195 = vmatpush3.bf16.msra.mxu0 %v2509_v51 }
 0x374   :  { %2196 = vmatprep.subr.bf16.mxu0 %v2700_v38 }
 0x377   :  { %2197 = vmatpush3.bf16.msra.mxu0 %v2510_v39 }
 0x378   :  { %2198 = vmatprep.subr.bf16.mxu0 %v2700_v38 }
 0x37b   :  { %2199 = vmatpush3.bf16.msra.mxu0 %v2511_v40 }
 0x37c   :  { %2200 = vmatprep.subr.bf16.mxu0 %v2700_v38 }
 0x37f   :  { %2201 = vmatpush3.bf16.msra.mxu0 %v2512_v41 }
 0x380   :  { %2202 = vmatprep.subr.bf16.mxu0 %v2700_v38 }
 0x383   :  { %2203 = vmatpush3.bf16.msra.mxu0 %v2513_v42 }
 0x384   :  { %2204 = vmatprep.subr.bf16.mxu0 %v2700_v38 }
 0x387   :  { %2205 = vmatpush3.bf16.msra.mxu0 %v2514_v43 }
 0x39f   :  { %v1413_v21 = vpop.f32.mrb[8].mxu1 }
 0x3a0   :  { %v1414_v22 = vadd.f32 %v1413_v21, %v1007_v30  ;;  %v1415_v23 = vpop.f32.mrb[9].mxu1 }
 0x3a1   :  { %v1416_v24 = vadd.f32 %v1415_v23, %v1011_v32  ;;  %v1417_v25 = vpop.f32.mrb[10].mxu1 }
 0x3a2   :  { %v1418_v26 = vadd.f32 %v1417_v25, %v1007_v30  ;;  %v1419_v28 = vpop.f32.mrb[11].mxu1  ;;  %v1424_v31 = vmax.f32 %v1414_v22, 0.0 }
 0x3a3   :  { %v1420_v29 = vadd.f32 %v1419_v28, %v1011_v32  ;;  %v1425_v34 = vmax.f32 %v1416_v24, 0.0 }
 0x3a4   :  { %v1428_v33 = vmax.f32 %v1418_v26, 0.0 }
 0x3a5   :  { %v1429_v35 = vmax.f32 %v1420_v29, 0.0 }
 0x3a6   :  { %v1432_v36 = vpack.c.bf16 %v1428_v33, %v1424_v31 }
 0x3a7   :  { %v1433_v37 = vpack.c.bf16 %v1429_v35, %v1425_v34 }
 0x3a9   :  { %1770 = vmatprep.mubr.bf16.mxu1 %v1433_v37 }
 0x3aa   :  { %1771 = vmatmul.mubr.bf16.vlgmr.msra.gmra.mrb[12].mxu1 %v1432_v36 }
 0x43d   :  { %v2153_v44 = vpop.f32.mrb[8].mxu0 }
 0x43e   :  { %v2154_v45 = vpop.f32.mrb[9].mxu0 }
 0x43f   :  { %v2155_v46 = vadd.f32 %v2154_v45, %v2153_v44  ;;  %v2156_v47 = vpop.f32.mrb[10].mxu0 }
 0x440   :  { %v2157_v49 = vpop.f32.mrb[11].mxu0 }
 0x441   :  { %v2158_v50 = vadd.f32 %v2157_v49, %v2156_v47  ;;  %v1732_v55 = vadd.f32 %v2155_v46, %v2095_v52 }
 0x443   :  { %v1735_v59 = vadd.f32 %v2158_v50, %v2095_v52 }
 0x47d   :  { %v2175_v53 = vpop.f32.mrb[12].mxu1 }
 0x47e   :  { %v2176_v54 = vpop.f32.mrb[13].mxu1 }
 0x47f   :  { %v2177_v56 = vadd.f32 %v2176_v54, %v2175_v53  ;;  %v2178_v57 = vpop.f32.mrb[14].mxu1 }
 0x480   :  { %v2179_v58 = vpop.f32.mrb[15].mxu1 }
 0x481   :  { %v1773_v60 = vadd.f32 %v2177_v56, %v1732_v55  ;;  %v2180_v61 = vadd.f32 %v2179_v58, %v2178_v57 }
 0x483   :  { %v1776_v62 = vadd.f32 %v2180_v61, %v1735_v59  ;;  %v1779_v63 = vmax.f32 %v1773_v60, 0.0 }
 0x485   :  { %v1780_v0 = vmax.f32 %v1776_v62, 0.0 }
 0x487   :  { %v1781_v1 = vpack.c.bf16 %v1780_v0, %v1779_v63 }
 0x489   :  { %2207 = vmatmul.mubr.bf16.vlgmr.msra.gmra.mrb[12].mxu0 %v1781_v1 }
 0x55c   :  { %v1887_v3 = vpop.f32.mrb[12].mxu0 }
 0x55d   :  { %v1888_v4 = vadd.f32 %v2128_v2, %v1887_v3  ;;  %v2208_v5 = vpop.f32.mrb[13].mxu0 }
 0x55e   :  { %v1890_v6 = vpop.f32.mrb[14].mxu0 }
 0x55f   :  { %1894 = vmax.xlane.f32.xlu0 %v1888_v4  ;;  %v2209_v7 = vpop.f32.mrb[15].mxu0  ;;  %v1891_v8 = vadd.f32 %v2128_v2, %v1890_v6 }
 0x563   :  { %1896 = vmax.xlane.f32.xlu0 %v1891_v8 }
 0x5ec   :  { %v1895_v9 = vpop.xlane.xlu0 %1894 }
 0x5ed   :  { %v1898_v10 = vsub.f32 %v1888_v4, %v1895_v9 }
 0x5ef   :  { %v1900_v11 = vmul.f32 1.442695, %v1898_v10 }
 0x5f0   :  { %v1897_v12 = vpop.xlane.xlu0 %1896 }
 0x5f1   :  { %2515 = vpow2.f32 %v1900_v11  ;;  %v1899_v13 = vsub.f32 %v1891_v8, %v1897_v12 }
 0x5f3   :  { %v1902_v14 = vmul.f32 1.442695, %v1899_v13 }
 0x5f5   :  { %2517 = vpow2.f32 %v1902_v14 }
 0x5fb   :  { %v2516_v15 = vpop.eup %2515 }
 0x5fc   :  { %1904 = vadd.xlane.f32.xlu1 %v2516_v15 }
 0x5ff   :  { %v2518_v16 = vpop.eup %2517 }
 0x600   :  { %1906 = vadd.xlane.f32.xlu1 %v2518_v16 }
 0x689   :  { %v1905_v17 = vpop.xlane.xlu1 %1904 }
 0x68a   :  { %2519 = vrcp.f32 %v1905_v17 }
 0x68d   :  { %v1907_v18 = vpop.xlane.xlu1 %1906 }
 0x68e   :  { %2521 = vrcp.f32 %v1907_v18 }
 0x694   :  { %v2520_v19 = vpop.eup %2519 }
 0x695   :  { %v1909_v20 = vmul.f32 %v2520_v19, %v2516_v15 }
 0x697   :  { %1912 = vst [vmem:[#allocation13] sm:$0xff] %v1909_v20 }
 0x698   :  { %v2522_v30 = vpop.eup %2521 }
 0x699   :  { %v1911_v32 = vmul.f32 %v2522_v30, %v2518_v16 }
 0x69b   :  { %1913 = vst [vmem:[#allocation13 + $0x8] sm:$0xff] %v1911_v32 }
 0x69c   :  { %2666 = shalt.err (!%p2663_p10)
}
 0x69d   :  { %s2667_s3 = scalar_lea.hbm %s2923_s11, 256 }
 0x69e   :  { %p2668_p11 = scmp.ne.s32.totalorder %s2923_s11, %s2667_s3  ;;  %p2671_p12 = scmp.lt.u32.totalorder %s2667_s3, %s2923_s11 }
 0x6a0   :  { %p2673_p13 = pnand %p2671_p12, %p2668_p11 }
 0x6a2   :  { %2676 = shalt.err (!%p2673_p13)
}
 0x6a3   :  { %1925 = dma.vmem_to_hbm [thread:$0]  %s1920_s10, 256, %s2923_s11, [#allocation4], %s2695_s0, %s2695_s0, %s2696_s15  }
 0x6a4   :  { %2685 = dma.done.wait [#allocation4], 256  }
 0x6a5   :  { %2686 = vsyncadd [#allocation4], 4294967040 }
 0x6a6   :  { %1929 = vsyncpa [#allocation3], 1 }
 0x6a7   :  { %1930 = vsyncpa [#allocation6], 1 }
 0x6a8   :  { %1931 = vsyncpa [#allocation9], 1 }
 0x6a9   :  { %1932 = vsyncpa [#allocation12], 1 }
 0x6aa   :  { %1933 = vsyncpa [#allocation4], 1 }

</bundles_post_ra>
